<compile_context>
chip_gen: v6e
topology: v6e:2x2x1
jax: 0.10.0
libtpu: 0.0.40
codegen_flags: <defaults>
</compile_context>

<pallas_src>
import math
from functools import partial

import jax
import jax.numpy as jnp
from jax.experimental import pallas as pl
from jax.experimental.pallas import tpu as pltpu


# -----------------------------------------------------------------------------
# Positional encoding (host-side parameter construction, deterministic)
# -----------------------------------------------------------------------------
def positional_encoding(max_pos, d_model):
    pos = jnp.arange(max_pos, dtype=jnp.float32)[:, None]            # (P, 1)
    i = jnp.arange(d_model, dtype=jnp.float32)[None, :]              # (1, D)
    angle_rates = 1.0 / jnp.power(10000.0, (2.0 * jnp.floor(i / 2.0)) / d_model)
    angle_rads = pos * angle_rates                                    # (P, D)
    pe = jnp.where((jnp.arange(d_model)[None, :] % 2) == 0,
                   jnp.sin(angle_rads), jnp.cos(angle_rads))
    return pe[None, :, :].astype(jnp.float32)                         # (1, P, D)


# -----------------------------------------------------------------------------
# Fused encoder-block kernel.  Grid = (batch, layer); one block per grid step.
# Activation x is carried across the layer axis in a persistent VMEM scratch.
# -----------------------------------------------------------------------------
def fused_block_kernel(x0_ref, bias_ref,
                       wqkv_ref, bqkv_ref, wo_ref, bo_ref,
                       w1_ref, b1_ref, w2_ref, b2_ref,
                       g1_ref, be1_ref, g2_ref, be2_ref,
                       out_ref, x_scr, ctx_scr, *, num_heads):
    f32 = jnp.float32
    bf16 = jnp.bfloat16
    S, D = x_scr.shape
    H = num_heads
    dh = D // H
    inv_n = 1.0 / float(S * D)          # LayerNorm 1/N as a compile-time constant
    eps = 1e-6

    layer = pl.program_id(1)

    # ---- layer 0: load the (embedding*sqrt(D) + pos-enc) activations ----
    @pl.when(layer == 0)
    def _():
        x_scr[...] = x0_ref[0]

    x = x_scr[...]                                                    # (S, D) f32
    x16 = x.astype(bf16)
    neg_bias = bias_ref[0]                                            # (1, S) additive key bias

    # ===== fused QKV: single lane-dense (S, D) @ (D, 3D) matmul (N = 3D) =====
    # (1/sqrt(dh) is pre-folded into the Q columns of wqkv / bqkv.)
    qkv = jnp.dot(x16, wqkv_ref[0], preferred_element_type=f32) + bqkv_ref[0]   # (S, 3D) f32

    # ===== per-head attention on static lane slices of the fused QKV output =====
    for h in range(H):
        qh = qkv[:, h * dh:(h + 1) * dh].astype(bf16)                 # (S, dh)
        kh = qkv[:, D + h * dh:D + (h + 1) * dh].astype(bf16)         # (S, dh)
        vh = qkv[:, 2 * D + h * dh:2 * D + (h + 1) * dh].astype(bf16) # (S, dh)

        logits = jnp.einsum('qd,kd->qk', qh, kh,
                            preferred_element_type=f32) + neg_bias    # (S, S) f32
        m = jnp.max(logits, axis=-1, keepdims=True)
        p = jnp.exp(logits - m)
        denom = jnp.sum(p, axis=-1, keepdims=True)
        p = p * pl.reciprocal(denom, approx=True)                     # EUP, not VPU divide

        ctx_h = jnp.dot(p.astype(bf16), vh, preferred_element_type=f32)  # (S, dh) f32
        ctx_scr[:, h * dh:(h + 1) * dh] = ctx_h                       # "concat heads" in place

    # ===== output projection: one fully-filled K=D matmul =====
    ctx = ctx_scr[...]                                                # (S, D) f32
    attn_out = jnp.dot(ctx.astype(bf16), wo_ref[0],
                       preferred_element_type=f32) + bo_ref[0]        # (S, D)

    # ===== residual + LayerNorm over the full (S, D) slab (normalized_shape=[S, D]) =====
    y1 = x + attn_out
    mu1 = jnp.sum(y1, axis=(0, 1), keepdims=True) * inv_n
    d1 = y1 - mu1
    var1 = jnp.sum(d1 * d1, axis=(0, 1), keepdims=True) * inv_n
    out1 = (d1 * jax.lax.rsqrt(var1 + eps) * g1_ref[0].astype(f32)
            + be1_ref[0].astype(f32))

    # ===== feed-forward =====
    h1 = jnp.dot(out1.astype(bf16), w1_ref[0],
                 preferred_element_type=f32) + b1_ref[0]              # (S, dff)
    h1 = jnp.maximum(h1, 0.0)
    ffn = jnp.dot(h1.astype(bf16), w2_ref[0],
                  preferred_element_type=f32) + b2_ref[0]             # (S, D)

    # ===== residual + LayerNorm 2 =====
    y2 = out1 + ffn
    mu2 = jnp.sum(y2, axis=(0, 1), keepdims=True) * inv_n
    d2 = y2 - mu2
    var2 = jnp.sum(d2 * d2, axis=(0, 1), keepdims=True) * inv_n
    x_new = (d2 * jax.lax.rsqrt(var2 + eps) * g2_ref[0].astype(f32)
             + be2_ref[0].astype(f32))

    x_scr[...] = x_new                                                # carry to next layer

    @pl.when(layer == pl.num_programs(1) - 1)
    def _():
        out_ref[0] = x_new                                            # final writeback


# -----------------------------------------------------------------------------
# Parameter construction (deterministic, synthetic) — packed + pre-scaled.
# -----------------------------------------------------------------------------
def init_encoder_params(key, num_blocks, input_seq_len, d_model, dff,
                        input_vocab_size, num_heads):
    dh = d_model // num_heads
    keys = jax.random.split(key, 1 + num_blocks)

    # sqrt(d_model) embedding scale folded into the table (zero runtime cost).
    embedding = (0.02 * math.sqrt(d_model)) * jax.random.normal(
        keys[0], (input_vocab_size, d_model), dtype=jnp.float32)

    def linear(k, din, dout):
        kw, kb = jax.random.split(k)
        w = (1.0 / math.sqrt(din)) * jax.random.normal(kw, (din, dout), dtype=jnp.float32)
        b = 0.01 * jax.random.normal(kb, (1, dout), dtype=jnp.float32)
        return w, b

    wqkv_l, bqkv_l, wo_l, bo_l = [], [], [], []
    w1_l, b1_l, w2_l, b2_l = [], [], [], []
    for i in range(num_blocks):
        ks = jax.random.split(keys[1 + i], 6)
        wq, bq = linear(ks[0], d_model, d_model)
        wk, bk = linear(ks[1], d_model, d_model)
        wv, bv = linear(ks[2], d_model, d_model)
        wo, bo = linear(ks[3], d_model, d_model)
        w1, b1 = linear(ks[4], d_model, dff)
        w2, b2 = linear(ks[5], dff, d_model)

        scale = 1.0 / math.sqrt(dh)                  # fold attention scale into Q
        wqkv_l.append(jnp.concatenate([wq * scale, wk, wv], axis=1))   # (D, 3D)
        bqkv_l.append(jnp.concatenate([bq * scale, bk, bv], axis=1))   # (1, 3D)
        wo_l.append(wo)                              # (D, D) — input is concat(heads)
        bo_l.append(bo)
        w1_l.append(w1); b1_l.append(b1)
        w2_l.append(w2); b2_l.append(b2)

    bf16 = jnp.bfloat16
    L, S, D = num_blocks, input_seq_len, d_model
    stacked = dict(
        wqkv=jnp.stack(wqkv_l).astype(bf16),   # (L, D, 3D)
        bqkv=jnp.stack(bqkv_l),                # (L, 1, 3D) f32
        wo=jnp.stack(wo_l).astype(bf16),       # (L, D, D)
        bo=jnp.stack(bo_l),                    # (L, 1, D)  f32
        w1=jnp.stack(w1_l).astype(bf16),       # (L, D, dff)
        b1=jnp.stack(b1_l),                    # (L, 1, dff) f32
        w2=jnp.stack(w2_l).astype(bf16),       # (L, dff, D)
        b2=jnp.stack(b2_l),                    # (L, 1, D)  f32
        # LayerNorm affine params in bf16 (identity init, exactly representable)
        g1=jnp.ones((L, S, D), bf16), be1=jnp.zeros((L, S, D), bf16),
        g2=jnp.ones((L, S, D), bf16), be2=jnp.zeros((L, S, D), bf16),
    )
    return {"embedding": embedding, "stacked": stacked}


# -----------------------------------------------------------------------------
# Full Encoder forward (one pallas_call, grid = (batch, layer))
# -----------------------------------------------------------------------------
def encoder_forward(tokens, mask, params, pos_enc, *, d_model, num_heads, num_blocks):
    B, S = tokens.shape
    D = d_model
    w = params["stacked"]
    dff = w["w1"].shape[-1]
    L = num_blocks

    # Embedding gather (data-dependent) + positional add stay in JAX glue;
    # sqrt(D) is already folded into the table.  Dropout == identity (eval).
    x0 = jnp.take(params["embedding"], tokens, axis=0) + pos_enc[:, :S, :]   # (B, S, D) f32
    # Additive key-padding bias (1.0 == masked key), layout-clean 3-D shape.
    attn_bias = (mask * jnp.float32(-1e9)).reshape(B, 1, S)                  # (B, 1, S) f32

    def batch_spec(shape):     # blocks indexed by the batch grid axis
        return pl.BlockSpec((1,) + shape, lambda b, l: (b,) + (0,) * len(shape))

    def layer_spec(shape):     # blocks indexed by the layer grid axis (weight streaming)
        return pl.BlockSpec((1,) + shape, lambda b, l: (l,) + (0,) * len(shape))

    in_specs = [
        batch_spec((S, D)),         # x0
        batch_spec((1, S)),         # attn_bias
        layer_spec((D, 3 * D)),     # wqkv
        layer_spec((1, 3 * D)),     # bqkv
        layer_spec((D, D)),         # wo
        layer_spec((1, D)),         # bo
        layer_spec((D, dff)),       # w1
        layer_spec((1, dff)),       # b1
        layer_spec((dff, D)),       # w2
        layer_spec((1, D)),         # b2
        layer_spec((S, D)),         # g1
        layer_spec((S, D)),         # be1
        layer_spec((S, D)),         # g2
        layer_spec((S, D)),         # be2
    ]

    kernel = partial(fused_block_kernel, num_heads=num_heads)
    return pl.pallas_call(
        kernel,
        out_shape=jax.ShapeDtypeStruct((B, S, D), jnp.float32),
        grid=(B, L),
        in_specs=in_specs,
        out_specs=pl.BlockSpec((1, S, D), lambda b, l: (b, 0, 0)),   # resident across layers
        scratch_shapes=[pltpu.VMEM((S, D), jnp.float32),             # carried activation x
                        pltpu.VMEM((S, D), jnp.float32)],            # concat-heads context
        compiler_params=pltpu.CompilerParams(
            dimension_semantics=("parallel", "arbitrary"),           # batch parallel, layers ordered
            vmem_limit_bytes=48 * 1024 * 1024),                      # explicit, < 64 MiB (v7x-safe)
    )(x0, attn_bias,
      w["wqkv"], w["bqkv"], w["wo"], w["bo"],
      w["w1"], w["b1"], w["w2"], w["b2"],
      w["g1"], w["be1"], w["g2"], w["be2"])


# -----------------------------------------------------------------------------
# Main
# -----------------------------------------------------------------------------
if __name__ == "__main__":
    num_blocks = 2
    batch = 2
    seq_len = 8
    d_model = 32
    num_heads = 4
    dff = 64
    input_vocab_size = 50
    max_pos_encoding = 16

    key = jax.random.PRNGKey(0)
    k_tok, k_params = jax.random.split(key)

    tokens = jax.random.randint(k_tok, (batch, seq_len), 0, input_vocab_size,
                                dtype=jnp.int32)
    # Padding mask: 1.0 = masked key position (last two positions of batch 1 masked).
    mask = jnp.zeros((batch, seq_len), jnp.float32).at[1, -2:].set(1.0)

    params = init_encoder_params(k_params, num_blocks, seq_len, d_model, dff,
                                 input_vocab_size, num_heads)
    pos_enc = positional_encoding(max_pos_encoding, d_model)

    fwd = jax.jit(partial(encoder_forward, d_model=d_model,
                          num_heads=num_heads, num_blocks=num_blocks))
    out = fwd(tokens, mask, params, pos_enc)
    out = jax.block_until_ready(out)

    assert out.shape == (batch, seq_len, d_model)
    assert bool(jnp.all(jnp.isfinite(out)))
    print("KERNEL_OK")
</pallas_src>

<mosaic_0001>
module attributes {stable_mosaic.version = 11 : i64} {
  func.func @fused_block_kernel(%arg0: i32, %arg1: i32, %arg2: memref<1x8x32xf32, #tpu.memory_space<vmem>>, %arg3: memref<1x1x8xf32, #tpu.memory_space<vmem>>, %arg4: memref<1x32x96xbf16, #tpu.memory_space<vmem>>, %arg5: memref<1x1x96xf32, #tpu.memory_space<vmem>>, %arg6: memref<1x32x32xbf16, #tpu.memory_space<vmem>>, %arg7: memref<1x1x32xf32, #tpu.memory_space<vmem>>, %arg8: memref<1x32x64xbf16, #tpu.memory_space<vmem>>, %arg9: memref<1x1x64xf32, #tpu.memory_space<vmem>>, %arg10: memref<1x64x32xbf16, #tpu.memory_space<vmem>>, %arg11: memref<1x1x32xf32, #tpu.memory_space<vmem>>, %arg12: memref<1x8x32xbf16, #tpu.memory_space<vmem>>, %arg13: memref<1x8x32xbf16, #tpu.memory_space<vmem>>, %arg14: memref<1x8x32xbf16, #tpu.memory_space<vmem>>, %arg15: memref<1x8x32xbf16, #tpu.memory_space<vmem>>, %arg16: memref<1x8x32xf32, #tpu.memory_space<vmem>>, %arg17: memref<8x32xf32, #tpu.memory_space<vmem>>, %arg18: memref<8x32xf32, #tpu.memory_space<vmem>>) attributes {dimension_semantics = [#tpu.dimension_semantics<parallel>, #tpu.dimension_semantics<arbitrary>], iteration_bounds = array<i64: 2, 2>, scalar_prefetch = 0 : i64, scratch_operands = 2 : i64, tpu.core_type = #tpu.core_type<tc>, window_params = [{transform_indices = @transform_0, window_bounds = array<i64: 1, 8, 32>}, {transform_indices = @transform_1, window_bounds = array<i64: 1, 1, 8>}, {transform_indices = @transform_2, window_bounds = array<i64: 1, 32, 96>}, {transform_indices = @transform_3, window_bounds = array<i64: 1, 1, 96>}, {transform_indices = @transform_4, window_bounds = array<i64: 1, 32, 32>}, {transform_indices = @transform_5, window_bounds = array<i64: 1, 1, 32>}, {transform_indices = @transform_6, window_bounds = array<i64: 1, 32, 64>}, {transform_indices = @transform_7, window_bounds = array<i64: 1, 1, 64>}, {transform_indices = @transform_8, window_bounds = array<i64: 1, 64, 32>}, {transform_indices = @transform_9, window_bounds = array<i64: 1, 1, 32>}, {transform_indices = @transform_10, window_bounds = array<i64: 1, 8, 32>}, {transform_indices = @transform_11, window_bounds = array<i64: 1, 8, 32>}, {transform_indices = @transform_12, window_bounds = array<i64: 1, 8, 32>}, {transform_indices = @transform_13, window_bounds = array<i64: 1, 8, 32>}, {transform_indices = @transform_14, window_bounds = array<i64: 1, 8, 32>}]} {
    %c0_i32 = arith.constant 0 : i32
    %0 = arith.cmpi eq, %arg1, %c0_i32 : i32
    %1 = arith.extui %0 : i1 to i32
    %c0_i32_0 = arith.constant 0 : i32
    %2 = arith.cmpi ne, %1, %c0_i32_0 : i32
    scf.if %2 {
      %c0_81 = arith.constant 0 : index
      %c0_82 = arith.constant 0 : index
      %c0_83 = arith.constant 0 : index
      %195 = vector.load %arg2[%c0_81, %c0_82, %c0_83] : memref<1x8x32xf32, #tpu.memory_space<vmem>>, vector<1x8x32xf32>
      %196 = vector.shape_cast %195 : vector<1x8x32xf32> to vector<8x32xf32>
      %c0_84 = arith.constant 0 : index
      %c0_85 = arith.constant 0 : index
      %197 = vector.load %arg17[%c0_84, %c0_85] : memref<8x32xf32, #tpu.memory_space<vmem>>, vector<8x32xf32>
      tpu.vector_store %arg17[%c0_84, %c0_85], %196 {strides = array<i32>} : memref<8x32xf32, #tpu.memory_space<vmem>>, vector<8x32xf32>,
    } else {
    }
    %c0 = arith.constant 0 : index
    %c0_1 = arith.constant 0 : index
    %3 = vector.load %arg17[%c0, %c0_1] : memref<8x32xf32, #tpu.memory_space<vmem>>, vector<8x32xf32>
    %4 = arith.truncf %3 : vector<8x32xf32> to vector<8x32xbf16>
    %c0_2 = arith.constant 0 : index
    %c0_3 = arith.constant 0 : index
    %c0_4 = arith.constant 0 : index
    %5 = vector.load %arg3[%c0_2, %c0_3, %c0_4] : memref<1x1x8xf32, #tpu.memory_space<vmem>>, vector<1x1x8xf32>
    %6 = vector.shape_cast %5 : vector<1x1x8xf32> to vector<1x8xf32>
    %c0_5 = arith.constant 0 : index
    %c0_6 = arith.constant 0 : index
    %c0_7 = arith.constant 0 : index
    %7 = vector.load %arg4[%c0_5, %c0_6, %c0_7] : memref<1x32x96xbf16, #tpu.memory_space<vmem>>, vector<1x32x96xbf16>
    %8 = vector.shape_cast %7 : vector<1x32x96xbf16> to vector<32x96xbf16>
    %cst = arith.constant dense<0.000000e+00> : vector<8x96xf32>
    %9 = tpu.matmul %4, %8, %cst {dimension_numbers = #tpu.dot_dimension_numbers<[1], [0], [0], [1], [0, 0, 1, 1], [], []>} : vector<8x32xbf16>, vector<32x96xbf16>, vector<8x96xf32> -> vector<8x96xf32>
    %c0_8 = arith.constant 0 : index
    %c0_9 = arith.constant 0 : index
    %c0_10 = arith.constant 0 : index
    %10 = vector.load %arg5[%c0_8, %c0_9, %c0_10] : memref<1x1x96xf32, #tpu.memory_space<vmem>>, vector<1x1x96xf32>
    %11 = vector.shape_cast %10 : vector<1x1x96xf32> to vector<1x96xf32>
    %12 = vector.broadcast %11 : vector<1x96xf32> to vector<8x96xf32>
    %13 = arith.addf %9, %12 : vector<8x96xf32>
    %14 = vector.extract_strided_slice %13 {offsets = [0, 0], sizes = [8, 8], strides = [1, 1]} : vector<8x96xf32> to vector<8x8xf32>
    %15 = arith.truncf %14 : vector<8x8xf32> to vector<8x8xbf16>
    %16 = vector.extract_strided_slice %13 {offsets = [0, 32], sizes = [8, 8], strides = [1, 1]} : vector<8x96xf32> to vector<8x8xf32>
    %17 = arith.truncf %16 : vector<8x8xf32> to vector<8x8xbf16>
    %18 = vector.extract_strided_slice %13 {offsets = [0, 64], sizes = [8, 8], strides = [1, 1]} : vector<8x96xf32> to vector<8x8xf32>
    %19 = arith.truncf %18 : vector<8x8xf32> to vector<8x8xbf16>
    "tpu.trace_start"() <{level = 10 : i32, message = "qd,kd->qk"}> : () -> ()
    %cst_11 = arith.constant dense<0.000000e+00> : vector<8x8xf32>
    %20 = tpu.matmul %15, %17, %cst_11 {dimension_numbers = #tpu.dot_dimension_numbers<[1], [1], [0], [0], [0, 0, 1, 0], [], []>} : vector<8x8xbf16>, vector<8x8xbf16>, vector<8x8xf32> -> vector<8x8xf32>
    "tpu.trace_stop"() : () -> ()
    %21 = vector.broadcast %6 : vector<1x8xf32> to vector<8x8xf32>
    %22 = arith.addf %20, %21 : vector<8x8xf32>
    %cst_12 = arith.constant dense<0xFF800000> : vector<8xf32>
    %23 = vector.multi_reduction <maximumf>, %22, %cst_12 [1] : vector<8x8xf32> to vector<8xf32>
    %24 = vector.shape_cast %23 : vector<8xf32> to vector<8x1xf32>
    %25 = vector.broadcast %24 : vector<8x1xf32> to vector<8x8xf32>
    %26 = arith.subf %22, %25 : vector<8x8xf32>
    %27 = math.exp %26 : vector<8x8xf32>
    %cst_13 = arith.constant dense<0.000000e+00> : vector<8xf32>
    %28 = vector.multi_reduction <add>, %27, %cst_13 [1] : vector<8x8xf32> to vector<8xf32>
    %29 = vector.shape_cast %28 : vector<8xf32> to vector<8x1xf32>
    %30 = tpu.reciprocal %29 {approx = true} : vector<8x1xf32> -> vector<8x1xf32>
    %31 = vector.broadcast %30 : vector<8x1xf32> to vector<8x8xf32>
    %32 = arith.mulf %27, %31 : vector<8x8xf32>
    %33 = arith.truncf %32 : vector<8x8xf32> to vector<8x8xbf16>
    %cst_14 = arith.constant dense<0.000000e+00> : vector<8x8xf32>
    %34 = tpu.matmul %33, %19, %cst_14 {dimension_numbers = #tpu.dot_dimension_numbers<[1], [0], [0], [1], [0, 0, 1, 1], [], []>} : vector<8x8xbf16>, vector<8x8xbf16>, vector<8x8xf32> -> vector<8x8xf32>
    %c0_15 = arith.constant 0 : index
    %c0_16 = arith.constant 0 : index
    %35 = vector.load %arg18[%c0_15, %c0_16] : memref<8x32xf32, #tpu.memory_space<vmem>>, vector<8x8xf32>
    tpu.vector_store %arg18[%c0_15, %c0_16], %34 {strides = array<i32>} : memref<8x32xf32, #tpu.memory_space<vmem>>, vector<8x8xf32>,
    %36 = vector.extract_strided_slice %13 {offsets = [0, 8], sizes = [8, 8], strides = [1, 1]} : vector<8x96xf32> to vector<8x8xf32>
    %37 = arith.truncf %36 : vector<8x8xf32> to vector<8x8xbf16>
    %38 = vector.extract_strided_slice %13 {offsets = [0, 40], sizes = [8, 8], strides = [1, 1]} : vector<8x96xf32> to vector<8x8xf32>
    %39 = arith.truncf %38 : vector<8x8xf32> to vector<8x8xbf16>
    %40 = vector.extract_strided_slice %13 {offsets = [0, 72], sizes = [8, 8], strides = [1, 1]} : vector<8x96xf32> to vector<8x8xf32>
    %41 = arith.truncf %40 : vector<8x8xf32> to vector<8x8xbf16>
    "tpu.trace_start"() <{level = 10 : i32, message = "qd,kd->qk"}> : () -> ()
    %cst_17 = arith.constant dense<0.000000e+00> : vector<8x8xf32>
    %42 = tpu.matmul %37, %39, %cst_17 {dimension_numbers = #tpu.dot_dimension_numbers<[1], [1], [0], [0], [0, 0, 1, 0], [], []>} : vector<8x8xbf16>, vector<8x8xbf16>, vector<8x8xf32> -> vector<8x8xf32>
    "tpu.trace_stop"() : () -> ()
    %43 = vector.broadcast %6 : vector<1x8xf32> to vector<8x8xf32>
    %44 = arith.addf %42, %43 : vector<8x8xf32>
    %cst_18 = arith.constant dense<0xFF800000> : vector<8xf32>
    %45 = vector.multi_reduction <maximumf>, %44, %cst_18 [1] : vector<8x8xf32> to vector<8xf32>
    %46 = vector.shape_cast %45 : vector<8xf32> to vector<8x1xf32>
    %47 = vector.broadcast %46 : vector<8x1xf32> to vector<8x8xf32>
    %48 = arith.subf %44, %47 : vector<8x8xf32>
    %49 = math.exp %48 : vector<8x8xf32>
    %cst_19 = arith.constant dense<0.000000e+00> : vector<8xf32>
    %50 = vector.multi_reduction <add>, %49, %cst_19 [1] : vector<8x8xf32> to vector<8xf32>
    %51 = vector.shape_cast %50 : vector<8xf32> to vector<8x1xf32>
    %52 = tpu.reciprocal %51 {approx = true} : vector<8x1xf32> -> vector<8x1xf32>
    %53 = vector.broadcast %52 : vector<8x1xf32> to vector<8x8xf32>
    %54 = arith.mulf %49, %53 : vector<8x8xf32>
    %55 = arith.truncf %54 : vector<8x8xf32> to vector<8x8xbf16>
    %cst_20 = arith.constant dense<0.000000e+00> : vector<8x8xf32>
    %56 = tpu.matmul %55, %41, %cst_20 {dimension_numbers = #tpu.dot_dimension_numbers<[1], [0], [0], [1], [0, 0, 1, 1], [], []>} : vector<8x8xbf16>, vector<8x8xbf16>, vector<8x8xf32> -> vector<8x8xf32>
    %c0_21 = arith.constant 0 : index
    %c8 = arith.constant 8 : index
    %57 = vector.load %arg18[%c0_21, %c8] : memref<8x32xf32, #tpu.memory_space<vmem>>, vector<8x8xf32>
    tpu.vector_store %arg18[%c0_21, %c8], %56 {strides = array<i32>} : memref<8x32xf32, #tpu.memory_space<vmem>>, vector<8x8xf32>,
    %58 = vector.extract_strided_slice %13 {offsets = [0, 16], sizes = [8, 8], strides = [1, 1]} : vector<8x96xf32> to vector<8x8xf32>
    %59 = arith.truncf %58 : vector<8x8xf32> to vector<8x8xbf16>
    %60 = vector.extract_strided_slice %13 {offsets = [0, 48], sizes = [8, 8], strides = [1, 1]} : vector<8x96xf32> to vector<8x8xf32>
    %61 = arith.truncf %60 : vector<8x8xf32> to vector<8x8xbf16>
    %62 = vector.extract_strided_slice %13 {offsets = [0, 80], sizes = [8, 8], strides = [1, 1]} : vector<8x96xf32> to vector<8x8xf32>
    %63 = arith.truncf %62 : vector<8x8xf32> to vector<8x8xbf16>
    "tpu.trace_start"() <{level = 10 : i32, message = "qd,kd->qk"}> : () -> ()
    %cst_22 = arith.constant dense<0.000000e+00> : vector<8x8xf32>
    %64 = tpu.matmul %59, %61, %cst_22 {dimension_numbers = #tpu.dot_dimension_numbers<[1], [1], [0], [0], [0, 0, 1, 0], [], []>} : vector<8x8xbf16>, vector<8x8xbf16>, vector<8x8xf32> -> vector<8x8xf32>
    "tpu.trace_stop"() : () -> ()
    %65 = vector.broadcast %6 : vector<1x8xf32> to vector<8x8xf32>
    %66 = arith.addf %64, %65 : vector<8x8xf32>
    %cst_23 = arith.constant dense<0xFF800000> : vector<8xf32>
    %67 = vector.multi_reduction <maximumf>, %66, %cst_23 [1] : vector<8x8xf32> to vector<8xf32>
    %68 = vector.shape_cast %67 : vector<8xf32> to vector<8x1xf32>
    %69 = vector.broadcast %68 : vector<8x1xf32> to vector<8x8xf32>
    %70 = arith.subf %66, %69 : vector<8x8xf32>
    %71 = math.exp %70 : vector<8x8xf32>
    %cst_24 = arith.constant dense<0.000000e+00> : vector<8xf32>
    %72 = vector.multi_reduction <add>, %71, %cst_24 [1] : vector<8x8xf32> to vector<8xf32>
    %73 = vector.shape_cast %72 : vector<8xf32> to vector<8x1xf32>
    %74 = tpu.reciprocal %73 {approx = true} : vector<8x1xf32> -> vector<8x1xf32>
    %75 = vector.broadcast %74 : vector<8x1xf32> to vector<8x8xf32>
    %76 = arith.mulf %71, %75 : vector<8x8xf32>
    %77 = arith.truncf %76 : vector<8x8xf32> to vector<8x8xbf16>
    %cst_25 = arith.constant dense<0.000000e+00> : vector<8x8xf32>
    %78 = tpu.matmul %77, %63, %cst_25 {dimension_numbers = #tpu.dot_dimension_numbers<[1], [0], [0], [1], [0, 0, 1, 1], [], []>} : vector<8x8xbf16>, vector<8x8xbf16>, vector<8x8xf32> -> vector<8x8xf32>
    %c0_26 = arith.constant 0 : index
    %c16 = arith.constant 16 : index
    %79 = vector.load %arg18[%c0_26, %c16] : memref<8x32xf32, #tpu.memory_space<vmem>>, vector<8x8xf32>
    tpu.vector_store %arg18[%c0_26, %c16], %78 {strides = array<i32>} : memref<8x32xf32, #tpu.memory_space<vmem>>, vector<8x8xf32>,
    %80 = vector.extract_strided_slice %13 {offsets = [0, 24], sizes = [8, 8], strides = [1, 1]} : vector<8x96xf32> to vector<8x8xf32>
    %81 = arith.truncf %80 : vector<8x8xf32> to vector<8x8xbf16>
    %82 = vector.extract_strided_slice %13 {offsets = [0, 56], sizes = [8, 8], strides = [1, 1]} : vector<8x96xf32> to vector<8x8xf32>
    %83 = arith.truncf %82 : vector<8x8xf32> to vector<8x8xbf16>
    %84 = vector.extract_strided_slice %13 {offsets = [0, 88], sizes = [8, 8], strides = [1, 1]} : vector<8x96xf32> to vector<8x8xf32>
    %85 = arith.truncf %84 : vector<8x8xf32> to vector<8x8xbf16>
    "tpu.trace_start"() <{level = 10 : i32, message = "qd,kd->qk"}> : () -> ()
    %cst_27 = arith.constant dense<0.000000e+00> : vector<8x8xf32>
    %86 = tpu.matmul %81, %83, %cst_27 {dimension_numbers = #tpu.dot_dimension_numbers<[1], [1], [0], [0], [0, 0, 1, 0], [], []>} : vector<8x8xbf16>, vector<8x8xbf16>, vector<8x8xf32> -> vector<8x8xf32>
    "tpu.trace_stop"() : () -> ()
    %87 = vector.broadcast %6 : vector<1x8xf32> to vector<8x8xf32>
    %88 = arith.addf %86, %87 : vector<8x8xf32>
    %cst_28 = arith.constant dense<0xFF800000> : vector<8xf32>
    %89 = vector.multi_reduction <maximumf>, %88, %cst_28 [1] : vector<8x8xf32> to vector<8xf32>
    %90 = vector.shape_cast %89 : vector<8xf32> to vector<8x1xf32>
    %91 = vector.broadcast %90 : vector<8x1xf32> to vector<8x8xf32>
    %92 = arith.subf %88, %91 : vector<8x8xf32>
    %93 = math.exp %92 : vector<8x8xf32>
    %cst_29 = arith.constant dense<0.000000e+00> : vector<8xf32>
    %94 = vector.multi_reduction <add>, %93, %cst_29 [1] : vector<8x8xf32> to vector<8xf32>
    %95 = vector.shape_cast %94 : vector<8xf32> to vector<8x1xf32>
    %96 = tpu.reciprocal %95 {approx = true} : vector<8x1xf32> -> vector<8x1xf32>
    %97 = vector.broadcast %96 : vector<8x1xf32> to vector<8x8xf32>
    %98 = arith.mulf %93, %97 : vector<8x8xf32>
    %99 = arith.truncf %98 : vector<8x8xf32> to vector<8x8xbf16>
    %cst_30 = arith.constant dense<0.000000e+00> : vector<8x8xf32>
    %100 = tpu.matmul %99, %85, %cst_30 {dimension_numbers = #tpu.dot_dimension_numbers<[1], [0], [0], [1], [0, 0, 1, 1], [], []>} : vector<8x8xbf16>, vector<8x8xbf16>, vector<8x8xf32> -> vector<8x8xf32>
    %c0_31 = arith.constant 0 : index
    %c24 = arith.constant 24 : index
    %101 = vector.load %arg18[%c0_31, %c24] : memref<8x32xf32, #tpu.memory_space<vmem>>, vector<8x8xf32>
    tpu.vector_store %arg18[%c0_31, %c24], %100 {strides = array<i32>} : memref<8x32xf32, #tpu.memory_space<vmem>>, vector<8x8xf32>,
    %c0_32 = arith.constant 0 : index
    %c0_33 = arith.constant 0 : index
    %102 = vector.load %arg18[%c0_32, %c0_33] : memref<8x32xf32, #tpu.memory_space<vmem>>, vector<8x32xf32>
    %103 = arith.truncf %102 : vector<8x32xf32> to vector<8x32xbf16>
    %c0_34 = arith.constant 0 : index
    %c0_35 = arith.constant 0 : index
    %c0_36 = arith.constant 0 : index
    %104 = vector.load %arg6[%c0_34, %c0_35, %c0_36] : memref<1x32x32xbf16, #tpu.memory_space<vmem>>, vector<1x32x32xbf16>
    %105 = vector.shape_cast %104 : vector<1x32x32xbf16> to vector<32x32xbf16>
    %cst_37 = arith.constant dense<0.000000e+00> : vector<8x32xf32>
    %106 = tpu.matmul %103, %105, %cst_37 {dimension_numbers = #tpu.dot_dimension_numbers<[1], [0], [0], [1], [0, 0, 1, 1], [], []>} : vector<8x32xbf16>, vector<32x32xbf16>, vector<8x32xf32> -> vector<8x32xf32>
    %c0_38 = arith.constant 0 : index
    %c0_39 = arith.constant 0 : index
    %c0_40 = arith.constant 0 : index
    %107 = vector.load %arg7[%c0_38, %c0_39, %c0_40] : memref<1x1x32xf32, #tpu.memory_space<vmem>>, vector<1x1x32xf32>
    %108 = vector.shape_cast %107 : vector<1x1x32xf32> to vector<1x32xf32>
    %109 = vector.broadcast %108 : vector<1x32xf32> to vector<8x32xf32>
    %110 = arith.addf %106, %109 : vector<8x32xf32>
    %111 = arith.addf %3, %110 : vector<8x32xf32>
    %112 = vector.shape_cast %111 : vector<8x32xf32> to vector<1x8x32xf32>
    %cst_41 = arith.constant dense<0.000000e+00> : vector<1xf32>
    %113 = vector.multi_reduction <add>, %112, %cst_41 [1, 2] : vector<1x8x32xf32> to vector<1xf32>
    %114 = vector.shape_cast %113 : vector<1xf32> to vector<1x1x1xf32>
    %115 = vector.extract %114[0, 0, 0] : f32 from vector<1x1x1xf32>
    %116 = vector.broadcast %115 : f32 to vector<1x1xf32>
    %cst_42 = arith.constant 3.906250e-03 : f32
    %117 = vector.broadcast %cst_42 : f32 to vector<1x1xf32>
    %118 = arith.mulf %116, %117 : vector<1x1xf32>
    %119 = vector.broadcast %118 : vector<1x1xf32> to vector<8x32xf32>
    %120 = arith.subf %111, %119 : vector<8x32xf32>
    %121 = arith.mulf %120, %120 : vector<8x32xf32>
    %122 = vector.shape_cast %121 : vector<8x32xf32> to vector<1x8x32xf32>
    %cst_43 = arith.constant dense<0.000000e+00> : vector<1xf32>
    %123 = vector.multi_reduction <add>, %122, %cst_43 [1, 2] : vector<1x8x32xf32> to vector<1xf32>
    %124 = vector.shape_cast %123 : vector<1xf32> to vector<1x1x1xf32>
    %125 = vector.extract %124[0, 0, 0] : f32 from vector<1x1x1xf32>
    %126 = vector.broadcast %125 : f32 to vector<1x1xf32>
    %cst_44 = arith.constant 3.906250e-03 : f32
    %127 = vector.broadcast %cst_44 : f32 to vector<1x1xf32>
    %128 = arith.mulf %126, %127 : vector<1x1xf32>
    %cst_45 = arith.constant 9.99999997E-7 : f32
    %129 = vector.broadcast %cst_45 : f32 to vector<1x1xf32>
    %130 = arith.addf %128, %129 : vector<1x1xf32>
    %131 = math.rsqrt %130 : vector<1x1xf32>
    %132 = vector.broadcast %131 : vector<1x1xf32> to vector<8x32xf32>
    %133 = arith.mulf %120, %132 : vector<8x32xf32>
    %c0_46 = arith.constant 0 : index
    %c0_47 = arith.constant 0 : index
    %c0_48 = arith.constant 0 : index
    %134 = vector.load %arg12[%c0_46, %c0_47, %c0_48] : memref<1x8x32xbf16, #tpu.memory_space<vmem>>, vector<1x8x32xbf16>
    %135 = vector.shape_cast %134 : vector<1x8x32xbf16> to vector<8x32xbf16>
    %136 = arith.extf %135 : vector<8x32xbf16> to vector<8x32xf32>
    %137 = arith.mulf %133, %136 : vector<8x32xf32>
    %c0_49 = arith.constant 0 : index
    %c0_50 = arith.constant 0 : index
    %c0_51 = arith.constant 0 : index
    %138 = vector.load %arg13[%c0_49, %c0_50, %c0_51] : memref<1x8x32xbf16, #tpu.memory_space<vmem>>, vector<1x8x32xbf16>
    %139 = vector.shape_cast %138 : vector<1x8x32xbf16> to vector<8x32xbf16>
    %140 = arith.extf %139 : vector<8x32xbf16> to vector<8x32xf32>
    %141 = arith.addf %137, %140 : vector<8x32xf32>
    %142 = arith.truncf %141 : vector<8x32xf32> to vector<8x32xbf16>
    %c0_52 = arith.constant 0 : index
    %c0_53 = arith.constant 0 : index
    %c0_54 = arith.constant 0 : index
    %143 = vector.load %arg8[%c0_52, %c0_53, %c0_54] : memref<1x32x64xbf16, #tpu.memory_space<vmem>>, vector<1x32x64xbf16>
    %144 = vector.shape_cast %143 : vector<1x32x64xbf16> to vector<32x64xbf16>
    %cst_55 = arith.constant dense<0.000000e+00> : vector<8x64xf32>
    %145 = tpu.matmul %142, %144, %cst_55 {dimension_numbers = #tpu.dot_dimension_numbers<[1], [0], [0], [1], [0, 0, 1, 1], [], []>} : vector<8x32xbf16>, vector<32x64xbf16>, vector<8x64xf32> -> vector<8x64xf32>
    %c0_56 = arith.constant 0 : index
    %c0_57 = arith.constant 0 : index
    %c0_58 = arith.constant 0 : index
    %146 = vector.load %arg9[%c0_56, %c0_57, %c0_58] : memref<1x1x64xf32, #tpu.memory_space<vmem>>, vector<1x1x64xf32>
    %147 = vector.shape_cast %146 : vector<1x1x64xf32> to vector<1x64xf32>
    %148 = vector.broadcast %147 : vector<1x64xf32> to vector<8x64xf32>
    %149 = arith.addf %145, %148 : vector<8x64xf32>
    %cst_59 = arith.constant 0.000000e+00 : f32
    %150 = vector.broadcast %cst_59 : f32 to vector<8x64xf32>
    %151 = arith.maximumf %149, %150 : vector<8x64xf32>
    %152 = arith.truncf %151 : vector<8x64xf32> to vector<8x64xbf16>
    %c0_60 = arith.constant 0 : index
    %c0_61 = arith.constant 0 : index
    %c0_62 = arith.constant 0 : index
    %153 = vector.load %arg10[%c0_60, %c0_61, %c0_62] : memref<1x64x32xbf16, #tpu.memory_space<vmem>>, vector<1x64x32xbf16>
    %154 = vector.shape_cast %153 : vector<1x64x32xbf16> to vector<64x32xbf16>
    %cst_63 = arith.constant dense<0.000000e+00> : vector<8x32xf32>
    %155 = tpu.matmul %152, %154, %cst_63 {dimension_numbers = #tpu.dot_dimension_numbers<[1], [0], [0], [1], [0, 0, 1, 1], [], []>} : vector<8x64xbf16>, vector<64x32xbf16>, vector<8x32xf32> -> vector<8x32xf32>
    %c0_64 = arith.constant 0 : index
    %c0_65 = arith.constant 0 : index
    %c0_66 = arith.constant 0 : index
    %156 = vector.load %arg11[%c0_64, %c0_65, %c0_66] : memref<1x1x32xf32, #tpu.memory_space<vmem>>, vector<1x1x32xf32>
    %157 = vector.shape_cast %156 : vector<1x1x32xf32> to vector<1x32xf32>
    %158 = vector.broadcast %157 : vector<1x32xf32> to vector<8x32xf32>
    %159 = arith.addf %155, %158 : vector<8x32xf32>
    %160 = arith.addf %141, %159 : vector<8x32xf32>
    %161 = vector.shape_cast %160 : vector<8x32xf32> to vector<1x8x32xf32>
    %cst_67 = arith.constant dense<0.000000e+00> : vector<1xf32>
    %162 = vector.multi_reduction <add>, %161, %cst_67 [1, 2] : vector<1x8x32xf32> to vector<1xf32>
    %163 = vector.shape_cast %162 : vector<1xf32> to vector<1x1x1xf32>
    %164 = vector.extract %163[0, 0, 0] : f32 from vector<1x1x1xf32>
    %165 = vector.broadcast %164 : f32 to vector<1x1xf32>
    %cst_68 = arith.constant 3.906250e-03 : f32
    %166 = vector.broadcast %cst_68 : f32 to vector<1x1xf32>
    %167 = arith.mulf %165, %166 : vector<1x1xf32>
    %168 = vector.broadcast %167 : vector<1x1xf32> to vector<8x32xf32>
    %169 = arith.subf %160, %168 : vector<8x32xf32>
    %170 = arith.mulf %169, %169 : vector<8x32xf32>
    %171 = vector.shape_cast %170 : vector<8x32xf32> to vector<1x8x32xf32>
    %cst_69 = arith.constant dense<0.000000e+00> : vector<1xf32>
    %172 = vector.multi_reduction <add>, %171, %cst_69 [1, 2] : vector<1x8x32xf32> to vector<1xf32>
    %173 = vector.shape_cast %172 : vector<1xf32> to vector<1x1x1xf32>
    %174 = vector.extract %173[0, 0, 0] : f32 from vector<1x1x1xf32>
    %175 = vector.broadcast %174 : f32 to vector<1x1xf32>
    %cst_70 = arith.constant 3.906250e-03 : f32
    %176 = vector.broadcast %cst_70 : f32 to vector<1x1xf32>
    %177 = arith.mulf %175, %176 : vector<1x1xf32>
    %cst_71 = arith.constant 9.99999997E-7 : f32
    %178 = vector.broadcast %cst_71 : f32 to vector<1x1xf32>
    %179 = arith.addf %177, %178 : vector<1x1xf32>
    %180 = math.rsqrt %179 : vector<1x1xf32>
    %181 = vector.broadcast %180 : vector<1x1xf32> to vector<8x32xf32>
    %182 = arith.mulf %169, %181 : vector<8x32xf32>
    %c0_72 = arith.constant 0 : index
    %c0_73 = arith.constant 0 : index
    %c0_74 = arith.constant 0 : index
    %183 = vector.load %arg14[%c0_72, %c0_73, %c0_74] : memref<1x8x32xbf16, #tpu.memory_space<vmem>>, vector<1x8x32xbf16>
    %184 = vector.shape_cast %183 : vector<1x8x32xbf16> to vector<8x32xbf16>
    %185 = arith.extf %184 : vector<8x32xbf16> to vector<8x32xf32>
    %186 = arith.mulf %182, %185 : vector<8x32xf32>
    %c0_75 = arith.constant 0 : index
    %c0_76 = arith.constant 0 : index
    %c0_77 = arith.constant 0 : index
    %187 = vector.load %arg15[%c0_75, %c0_76, %c0_77] : memref<1x8x32xbf16, #tpu.memory_space<vmem>>, vector<1x8x32xbf16>
    %188 = vector.shape_cast %187 : vector<1x8x32xbf16> to vector<8x32xbf16>
    %189 = arith.extf %188 : vector<8x32xbf16> to vector<8x32xf32>
    %190 = arith.addf %186, %189 : vector<8x32xf32>
    %c0_78 = arith.constant 0 : index
    %c0_79 = arith.constant 0 : index
    %191 = vector.load %arg17[%c0_78, %c0_79] : memref<8x32xf32, #tpu.memory_space<vmem>>, vector<8x32xf32>
    tpu.vector_store %arg17[%c0_78, %c0_79], %190 {strides = array<i32>} : memref<8x32xf32, #tpu.memory_space<vmem>>, vector<8x32xf32>,
    %c1_i32 = arith.constant 1 : i32
    %192 = arith.cmpi eq, %arg1, %c1_i32 : i32
    %193 = arith.extui %192 : i1 to i32
    %c0_i32_80 = arith.constant 0 : i32
    %194 = arith.cmpi ne, %193, %c0_i32_80 : i32
    scf.if %194 {
      %c0_81 = arith.constant 0 : index
      %c0_82 = arith.constant 0 : index
      %c0_83 = arith.constant 0 : index
      %195 = vector.load %arg16[%c0_81, %c0_82, %c0_83] : memref<1x8x32xf32, #tpu.memory_space<vmem>>, vector<1x8x32xf32>
      %196 = vector.shape_cast %195 : vector<1x8x32xf32> to vector<8x32xf32>
      %197 = vector.shape_cast %190 : vector<8x32xf32> to vector<1x8x32xf32>
      tpu.vector_store %arg16[%c0_81, %c0_82, %c0_83], %197 {strides = array<i32>} : memref<1x8x32xf32, #tpu.memory_space<vmem>>, vector<1x8x32xf32>,
    } else {
    }
    return
  }
  func.func @transform_0(%arg0: i32, %arg1: i32) -> (i32, i32, i32) {
    %c0_i32 = arith.constant 0 : i32
    %c0_i32_0 = arith.constant 0 : i32
    %c0_i32_1 = arith.constant 0 : i32
    return %arg0, %c0_i32, %c0_i32_0 : i32, i32, i32
  }
  func.func @transform_1(%arg0: i32, %arg1: i32) -> (i32, i32, i32) {
    %c0_i32 = arith.constant 0 : i32
    %c0_i32_0 = arith.constant 0 : i32
    %c0_i32_1 = arith.constant 0 : i32
    return %arg0, %c0_i32, %c0_i32_0 : i32, i32, i32
  }
  func.func @transform_2(%arg0: i32, %arg1: i32) -> (i32, i32, i32) {
    %c0_i32 = arith.constant 0 : i32
    %c0_i32_0 = arith.constant 0 : i32
    %c0_i32_1 = arith.constant 0 : i32
    return %arg1, %c0_i32, %c0_i32_0 : i32, i32, i32
  }
  func.func @transform_3(%arg0: i32, %arg1: i32) -> (i32, i32, i32) {
    %c0_i32 = arith.constant 0 : i32
    %c0_i32_0 = arith.constant 0 : i32
    %c0_i32_1 = arith.constant 0 : i32
    return %arg1, %c0_i32, %c0_i32_0 : i32, i32, i32
  }
  func.func @transform_4(%arg0: i32, %arg1: i32) -> (i32, i32, i32) {
    %c0_i32 = arith.constant 0 : i32
    %c0_i32_0 = arith.constant 0 : i32
    %c0_i32_1 = arith.constant 0 : i32
    return %arg1, %c0_i32, %c0_i32_0 : i32, i32, i32
  }
  func.func @transform_5(%arg0: i32, %arg1: i32) -> (i32, i32, i32) {
    %c0_i32 = arith.constant 0 : i32
    %c0_i32_0 = arith.constant 0 : i32
    %c0_i32_1 = arith.constant 0 : i32
    return %arg1, %c0_i32, %c0_i32_0 : i32, i32, i32
  }
  func.func @transform_6(%arg0: i32, %arg1: i32) -> (i32, i32, i32) {
    %c0_i32 = arith.constant 0 : i32
    %c0_i32_0 = arith.constant 0 : i32
    %c0_i32_1 = arith.constant 0 : i32
    return %arg1, %c0_i32, %c0_i32_0 : i32, i32, i32
  }
  func.func @transform_7(%arg0: i32, %arg1: i32) -> (i32, i32, i32) {
    %c0_i32 = arith.constant 0 : i32
    %c0_i32_0 = arith.constant 0 : i32
    %c0_i32_1 = arith.constant 0 : i32
    return %arg1, %c0_i32, %c0_i32_0 : i32, i32, i32
  }
  func.func @transform_8(%arg0: i32, %arg1: i32) -> (i32, i32, i32) {
    %c0_i32 = arith.constant 0 : i32
    %c0_i32_0 = arith.constant 0 : i32
    %c0_i32_1 = arith.constant 0 : i32
    return %arg1, %c0_i32, %c0_i32_0 : i32, i32, i32
  }
  func.func @transform_9(%arg0: i32, %arg1: i32) -> (i32, i32, i32) {
    %c0_i32 = arith.constant 0 : i32
    %c0_i32_0 = arith.constant 0 : i32
    %c0_i32_1 = arith.constant 0 : i32
    return %arg1, %c0_i32, %c0_i32_0 : i32, i32, i32
  }
  func.func @transform_10(%arg0: i32, %arg1: i32) -> (i32, i32, i32) {
    %c0_i32 = arith.constant 0 : i32
    %c0_i32_0 = arith.constant 0 : i32
    %c0_i32_1 = arith.constant 0 : i32
    return %arg1, %c0_i32, %c0_i32_0 : i32, i32, i32
  }
  func.func @transform_11(%arg0: i32, %arg1: i32) -> (i32, i32, i32) {
    %c0_i32 = arith.constant 0 : i32
    %c0_i32_0 = arith.constant 0 : i32
    %c0_i32_1 = arith.constant 0 : i32
    return %arg1, %c0_i32, %c0_i32_0 : i32, i32, i32
  }
  func.func @transform_12(%arg0: i32, %arg1: i32) -> (i32, i32, i32) {
    %c0_i32 = arith.constant 0 : i32
    %c0_i32_0 = arith.constant 0 : i32
    %c0_i32_1 = arith.constant 0 : i32
    return %arg1, %c0_i32, %c0_i32_0 : i32, i32, i32
  }
  func.func @transform_13(%arg0: i32, %arg1: i32) -> (i32, i32, i32) {
    %c0_i32 = arith.constant 0 : i32
    %c0_i32_0 = arith.constant 0 : i32
    %c0_i32_1 = arith.constant 0 : i32
    return %arg1, %c0_i32, %c0_i32_0 : i32, i32, i32
  }
  func.func @transform_14(%arg0: i32, %arg1: i32) -> (i32, i32, i32) {
    %c0_i32 = arith.constant 0 : i32
    %c0_i32_0 = arith.constant 0 : i32
    %c0_i32_1 = arith.constant 0 : i32
    return %arg0, %c0_i32, %c0_i32_0 : i32, i32, i32
  }
}

</mosaic_0001>

<bundles_post_ra>
// kernel: encoder_forward.1
= control target key start
LH: loop header
LB: loop body
LE: loop exit
PB: predicated region body
PF: predicated region fallthrough
CT: control target
= control target key end

     0   :  { %s2588_s0 = inlined_call_operand.vmem [shape: f32[2,8,32], index: 0, kind: input, shape index: {}]   ;;  %s2589_s1 = inlined_call_operand.vmem [shape: f32[2,1,8], index: 1, kind: input, shape index: {}]   ;;  %s2590_s2 = inlined_call_operand.vmem [shape: bf16[2,32,96], index: 2, kind: input, shape index: {}]   ;;  %s2591_s3 = inlined_call_operand.vmem [shape: f32[2,1,96], index: 3, kind: input, shape index: {}]   ;;  %s2592_s4 = inlined_call_operand.vmem [shape: bf16[2,32,32], index: 4, kind: input, shape index: {}]   ;;  %s2593_s5 = inlined_call_operand.vmem [shape: f32[2,1,32], index: 5, kind: input, shape index: {}]   ;;  %s2594_s6 = inlined_call_operand.vmem [shape: bf16[2,32,64], index: 6, kind: input, shape index: {}]   ;;  %s2595_s7 = inlined_call_operand.vmem [shape: f32[2,1,64], index: 7, kind: input, shape index: {}]   ;;  %s2596_s8 = inlined_call_operand.vmem [shape: bf16[2,64,32], index: 8, kind: input, shape index: {}]   ;;  %s2597_s9 = inlined_call_operand.vmem [shape: f32[2,1,32], index: 9, kind: input, shape index: {}]   ;;  %s2598_s10 = inlined_call_operand.vmem [shape: bf16[2,8,32], index: 10, kind: input, shape index: {}]   ;;  %s2599_s11 = inlined_call_operand.vmem [shape: bf16[2,8,32], index: 11, kind: input, shape index: {}]   ;;  %s2600_s12 = inlined_call_operand.vmem [shape: bf16[2,8,32], index: 12, kind: input, shape index: {}]   ;;  %s2601_s13 = inlined_call_operand.vmem [shape: bf16[2,8,32], index: 13, kind: input, shape index: {}]   ;;  %s2602_s14 = inlined_call_operand.hbm [shape: f32[2,8,32], index: 14, kind: output, shape index: {}]  }
   0x1   :  { %2618 = sst [smem:[#allocation20_spill]] %s2588_s0 }
   0x2   :  { %2619 = sst [smem:[#allocation21_spill]] %s2590_s2 }
   0x3   :  { %2620 = sst [smem:[#allocation22_spill]] %s2592_s4 }
   0x4   :  { %2621 = sst [smem:[#allocation23_spill]] %s2594_s6 }
   0x5   :  { %2622 = sst [smem:[#allocation24_spill]] %s2596_s8 }
   0x6   :  { %2623 = sst [smem:[#allocation25_spill]] %s2597_s9 }
   0x7   :  { %2624 = sst [smem:[#allocation26_spill]] %s2599_s11 }
   0x8   :  { %2625 = sst [smem:[#allocation27_spill]] %s2600_s12 }
   0x9   :  { %2626 = sst [smem:[#allocation28_spill]] %s2601_s13 }
   0xa   :  { %2627 = sst [smem:[#allocation29_spill]] %s2602_s14 }
   0xb   :  { %19 = vsyncpa [#allocation5], 0 }
   0xc   :  { %21 = vsyncpa [#allocation5 + $0x1], 0  ;;  %s2242_s29 = smov 0   ;;  %s2244_s30 = smov 0  }
   0xd   :  { %s2246_s15 = smov 0   ;;  %s2248_s16 = smov 0  }
   0xe   :  { %s2250_s17 = smov 0   ;;  %s2252_s18 = smov 0  }
   0xf   :  { %s2254_s19 = smov 0   ;;  %s2256_s20 = smov 0  }
  0x10 LB: > { %2628 = sst [smem:[#allocation7_spill]] %s2120_s29  ;;  %s1761_s21 = sadd.s32 4294967295, %s2148_s20   ;;  %s2148_s20 = sphi %s2256_s20, %s27_s20   ;;  %s2144_s19 = sphi %s2254_s19, %s2678_s19   ;;  %s2140_s18 = sphi %s2252_s18, %s2677_s18   ;;  %s2136_s17 = sphi %s2250_s17, %s2676_s17   ;;  %s2132_s16 = sphi %s2248_s16, %s2675_s16   ;;  %s2128_s15 = sphi %s2246_s15, %s2674_s15   ;;  %s2124_s30 = sphi %s2244_s30, %s2673_s30   ;;  %s2120_s29 = sphi %s2242_s29, %s2672_s29  }
  0x11   : > { %2629 = sst [smem:[#allocation8_spill]] %s2124_s30  ;;  %s1762_s22 = sadd.s32 4294967294, %s2148_s20  }
  0x12   : > { %2630 = sst [smem:[#allocation9_spill]] %s2128_s15  ;;  %s36_s23 = sadd.s32 1, %s2140_s18 }
  0x13   : > { %2631 = sst [smem:[#allocation10_spill]] %s2132_s16  ;;  %p37_p0 = scmp.ge.s32.totalorder %s36_s23, 2 }
  0x14   : > { %2632 = sst [smem:[#allocation11_spill]] %s2136_s17  ;;  %s39_s24 = sadd.s32 1, %s2144_s19 }
  0x15   : > { %2633 = sst [smem:[#allocation12_spill]] %s2140_s18  ;;  %p420_p1 = scmp.ne.s32.totalorder %s2128_s15, %s2124_s30 }
  0x16   : > { %2634 = sst [smem:[#allocation13_spill]] %s2144_s19  ;;  %p421_p2 = scmp.eq.s32.totalorder %s1761_s21, 3 }
  0x17   : > { %2635 = sst [smem:[#allocation14_spill]] %s2148_s20  ;;  %s2680_s23 = smov (%p37_p0, %s36_s23), 0 }
  0x18   : > { %2636 = sst [smem:[#allocation15_spill]] %s2680_s23  ;;  %s2682_s24 = smov (!%p37_p0, %s39_s24), %s2144_s19 }
  0x19   : > { %p2291_p3 = por %p421_p2, %p420_p1  ;;  %p426_p4 = scmp.ne.s32.totalorder %s2124_s30, %s2120_s29 }
  0x1a   : > { %p41_p5 = scmp.ge.s32.totalorder %s2682_s24, 2  ;;  %p427_p6 = scmp.eq.s32.totalorder %s1762_s22, 3 }
  0x1b   : > { %s2637_s25 = scalar_select %p2291_p3, 1, 0 }
  0x1c   : > { %p1765_p7 = scmp.ge.s32.totalorder %s2148_s20, 1  ;;  %p542_p8 = scmp.lt.s32.totalorder %s2148_s20, 5 }
  0x1d   : > { %2638 = sst [smem:[#allocation16_spill]] %s2637_s25  ;;  %s2684_s24 = smov (%p41_p5, %s2682_s24), 0 }
  0x1e   : > { %2639 = sst [smem:[#allocation17_spill]] %s2684_s24  ;;  %p2301_p9 = por %p427_p6, %p426_p4 }
  0x1f   : > { %p543_p10 = pnand %p1765_p7, %p542_p8  ;;  %s407_s27 = ssub.s32 %s2144_s19, %s2684_s24 }
  0x20   : > { %s2640_s26 = scalar_select %p2301_p9, 1, 0 }
  0x21   : > { %s410_s28 = sadd.s32 1, %s2128_s15  ;;  %p408_p11 = scmp.eq.s32.totalorder %s407_s27, 0 }
  0x22   : > { %2641 = sst [smem:[#allocation18_spill]] %s2640_s26  ;;  %546 = sbr.rel (%p543_p10) target bundleno = 2770 (0xad2), region = 76 }
  0x23   : > { %s2309_s21 = scalar_select %p408_p11, %s2128_s15, %s410_s28  }
  0x24   : > { %s2606_s22 = sand.u32 (!%p543_p10), 1, %s2124_s30   ;;  %p638_p12 = scmp.lt.s32.totalorder (!%p543_p10), %s2136_s17, 1 }
  0x25   : > { %2642 = sst [smem:[#allocation19_spill]] %s2309_s21  ;;  %s2315_s23 = sshll.u32 (!%p543_p10), %s2606_s22, 3 }
  0x26   : > { %p645_p13 = scmp.lt.s32.totalorder (!%p543_p10), %s2132_s16, 1  ;;  %s2643_s0 = sld [smem:[#allocation20_spill]] (!%p543_p10) }
  0x27   : > { %s2319_s18 = scalar_select %p638_p12, %s2136_s17, 1 }
  0x28   : > { %s2322_s27 = scalar_select %p645_p13, %s2132_s16, 1 }
  0x29   : > { %s1767_s28 = sshll.u32 %s2319_s18, 3  ;;  %s2644_s2 = sld [smem:[#allocation21_spill]] }
  0x2a   : > { %s1813_s29 = sshll.u32 %s2322_s27, 4  ;;  %s2645_s4 = sld [smem:[#allocation22_spill]] }
  0x2b   : > { %s2646_s6 = sld [smem:[#allocation23_spill]]  ;;  %s1816_s30 = sshll.u32 %s2322_s27, 5 }
  0x2c   : > { %s641_s26 = scalar_lea.vmem %s2643_s0, %s1767_s28  ;;  %s2648_s8 = sld [smem:[#allocation24_spill]] }
  0x2d   : > { %s2369_s19 = sshll.u32 %s2322_s27, 2  ;;  %s2649_s20 = sld [smem:[#allocation26_spill]] }
  0x2e   : > { %s680_s21 = scalar_lea.vmem %s2598_s10, %s2369_s19  ;;  %s2650_s0 = sld [smem:[#allocation27_spill]] }
  0x2f   : > { %s649_s25 = scalar_lea.vmem %s2644_s2, %s1813_s29  ;;  %s2651_s15 = sld [smem:[#allocation28_spill]] }
  0x30   : > { %s2343_s11 = scalar_lea.vmem %s2645_s4, %s1813_s29  ;;  %s2652_s9 = sld [smem:[#allocation10_spill]] }
  0x31   : > { %s2352_s22 = scalar_lea.vmem %s2646_s6, %s1813_s29 }
  0x32   : > { %s2366_s4 = scalar_lea.vmem %s2648_s8, %s1816_s30  ;;  %s637_s8 = scalar_lea.vmem [#allocation4], %s2315_s23 }
  0x33   : > { %s684_s16 = scalar_lea.vmem %s2649_s20, %s2369_s19 }
  0x34   : > { %s688_s2 = scalar_lea.vmem %s2650_s0, %s2369_s19 }
  0x35   : > { %s692_s6 = scalar_lea.vmem %s2651_s15, %s2369_s19 }
  0x36   : > { %p1780_p0 = scmp.ne.s32.totalorder %s2652_s9, 0 }
  0x38   : > { %697 = sbr.rel (%p1780_p0) target bundleno = 63 (0x3f), region = 80 }
  0x3d   : > { %v698_v0 = vld [vmem:[%s641_s26] sm:$0xff]  ;;  %vm699_vm0 = vcmask 261120  }
  0x3e   : > { %700 = vst.msk [vmem:[#allocation2] sm:$0xff] %vm699_vm0, %v698_v0 }
  0x3f PF: > { %v2026_v1 = vld [vmem:[%s649_s25 + $0x8] sm:$0xff]   ;;  %v2150_v2 = vmov 0.0   ;;  %v2027_v3 = vld [vmem:[%s649_s25] sm:$0xff]   ;;  %vm2151_vm1 = vmmov 0   ;;  %vm727_vm2 = vcmask 261120   ;;  %s2653_s25 = scalar_lea.vmem %s2591_s3, %s2322_s27  ;;  %s2152_s26 = smov 120  }
  0x40   : > { %1847 = vmatprep.subr.bf16.mxu0 %v2150_v2  ;;  %1855 = vmatprep.subr.bf16.mxu1 %v2150_v2  ;;  %v1781_v6 = vld [vmem:[%s2653_s25] ss:$0 sm:$0xff]  ;;  %s2153_s15 = smov 96   ;;  %s2154_s12 = smov 80   ;;  %vm781_vm3 = vcmask 64512   ;;  %vm845_vm4 = vcmask 1043456  }
  0x41   : > { %1848 = vmatpush3.bf16.msra.mxu0 %v2026_v1  ;;  %1851 = vmatprep.mubr.msk.bf16.mxu0 %vm2151_vm1, %v2150_v2  ;;  %s2155_s24 = smov 88   ;;  %s2156_s29 = smov 72   ;;  %vm1004_vm5 = vcmask 130112   ;;  %vm1120_vm6 = vcmask 195712   ;;  %vm1236_vm7 = vcmask 261312   ;;  %vm1450_vm8 = vcmask 523264  }
  0x42   : > { %1849 = vmatprep.subr.bf16.mxu0 %v2150_v2  ;;  %1857 = vmatprep.mubr.msk.bf16.mxu1 %vm2151_vm1, %v2150_v2  ;;  %s2157_s28 = smov 112   ;;  %s2158_s14 = smov 104  }
  0x43   : > { %s2654_s30 = scalar_lea.vmem %s2589_s1, %s2319_s18  ;;  %s2159_s18 = smov 56  }
  0x44   : > { %v1785_v24 = vld [vmem:[%s2654_s30] ss:$0 sm:$0xff]  ;;  %s2160_s13 = smov 64   ;;  %s2161_s0 = smov 40  }
  0x45   : > { %v2393_v4 = vld [vmem:[#allocation2] sm:$0xff]  ;;  %1850 = vmatpush3.bf16.msra.mxu0 %v2027_v3  ;;  %s2162_s9 = smov 48   ;;  %s2163_s25 = smov 8  }
  0x46   : > { %v702_v5 = vpack.c.bf16 %v2393_v4, %v2393_v4  ;;  %1861 = vmatprep.subr.bf16.mxu0 %v2150_v2 }
  0x48   : > { %1852 = vmatmul.mubr.msk.bf16.vlgmr.msra.gmra.mxu0 %vm727_vm2, %v702_v5 }
  0x49   : > { %1863 = vmatprep.mubr.msk.bf16.mxu0 %vm2151_vm1, %v2150_v2 }
 0x108   : > { %v765_v7 = vpop.f32.mrf.mxu0 }
 0x109   : > { %v766_v8 = vadd.f32 %v1781_v6, %v765_v7 }
 0x10a   : > { %v1853_v9 = vpop.f32.mrf.mxu0 }
 0x10b   : > { %v2409_v10 = vpack.c.bf16 %v766_v8, %v766_v8 }
 0x10c   : > { %v768_v11 = vpop.f32.mrf.mxu0 }
 0x10d   : > { %890 = vrot.lane.b32.xlu1 %v2409_v10, %s2152_s26  ;;  %779 = vrot.lane.b32.xlu0 %v2409_v10, %s2153_s15  ;;  %s2164_s26 = smov 16   ;;  %s2165_s15 = smov 24  }
 0x10e   : > { %v1854_v12 = vpop.f32.mrf.mxu0 }
 0x111   : > { %1008 = vrot.lane.b32.xlu1 %v2409_v10, %s2154_s12  ;;  %892 = vrot.lane.b32.xlu0 %v2409_v10, %s2155_s24  ;;  %s2655_s24 = scalar_lea.vmem %s2593_s5, %s2322_s27 }
 0x115   : > { %1124 = vrot.lane.b32.xlu1 %v2409_v10, %s2156_s29  ;;  %1006 = vrot.lane.b32.xlu0 %v2409_v10, %s2157_s28 }
 0x119   : > { %1122 = vrot.lane.b32.xlu0 %v2409_v10, %s2158_s14 }
 0x17f   : > { %v780_v13 = vpop.permute.xlu0 %779  ;;  %v891_v16 = vpop.permute.xlu1 %890 }
 0x180   : > { %v786_v14 = vsel %vm781_vm3, %v780_v13, 0 }
 0x181   : > { %1856 = vmatpush3.bf16.xpose.msra.mxu1 %v786_v14 }
 0x182   : > { %1867 = vmatprep.subr.bf16.mxu1 %v2150_v2 }
 0x183   : > { %v893_v15 = vpop.permute.xlu0 %892  ;;  %v1009_v18 = vpop.permute.xlu1 %1008 }
 0x184   : > { %v898_v17 = vsel %vm781_vm3, %v893_v15, 0  ;;  %v1014_v19 = vsel %vm781_vm3, %v1009_v18, 0 }
 0x187   : > { %v1125_v20 = vpop.permute.xlu1 %1124  ;;  %v1007_v21 = vpop.permute.xlu0 %1006 }
 0x188   : > { %1858 = vmatmul.mubr.msk.bf16.vlgmr.msra.gmra.mxu1 %vm781_vm3, %v2409_v10  ;;  %v1130_v22 = vsel %vm781_vm3, %v1125_v20, 0 }
 0x189   : > { %1868 = vmatpush3.bf16.xpose.msra.mxu1 %v898_v17  ;;  %1869 = vmatprep.mubr.msk.bf16.mxu1 %vm2151_vm1, %v2150_v2 }
 0x18a   : > { %1879 = vmatprep.subr.bf16.mxu1 %v2150_v2 }
 0x18b   : > { %v1123_v23 = vpop.permute.xlu0 %1122 }
 0x190   : > { %1870 = vmatmul.mubr.msk.bf16.vlgmr.msra.gmra.mxu1 %vm781_vm3, %v891_v16 }
 0x191   : > { %1880 = vmatpush3.bf16.xpose.msra.mxu1 %v1014_v19  ;;  %1881 = vmatprep.mubr.msk.bf16.mxu1 %vm2151_vm1, %v2150_v2 }
 0x192   : > { %1891 = vmatprep.subr.bf16.mxu1 %v2150_v2 }
 0x198   : > { %1882 = vmatmul.mubr.msk.bf16.vlgmr.msra.gmra.mxu1 %vm781_vm3, %v1007_v21 }
 0x199   : > { %1892 = vmatpush3.bf16.xpose.msra.mxu1 %v1130_v22  ;;  %1893 = vmatprep.mubr.msk.bf16.mxu1 %vm2151_vm1, %v2150_v2 }
 0x19a   : > { %1903 = vmatprep.subr.bf16.mxu1 %v2150_v2 }
 0x1a0   : > { %1894 = vmatmul.mubr.msk.bf16.vlgmr.msra.gmra.mxu1 %vm781_vm3, %v1123_v23 }
 0x1a1   : > { %1907 = vmatprep.mubr.msk.bf16.mxu1 %vm2151_vm1, %v2150_v2 }
 0x248   : > { %v822_v25 = vpop.f32.mrf.mxu1 }
 0x249   : > { %v823_v26 = vadd.f32 %v1785_v24, %v822_v25 }
 0x24a   : > { %v1859_v27 = vpop.f32.mrf.mxu1 }
 0x24b   : > { %v828_v28 = vsel %vm781_vm3, %v823_v26, -inf }
 0x24c   : > { %829 = vmax.xlane.f32.xlu1 %v828_v28  ;;  %v825_v29 = vpop.f32.mrf.mxu1 }
 0x24e   : > { %v1860_v30 = vpop.f32.mrf.mxu1 }
 0x250   : > { %v934_v31 = vpop.f32.mrf.mxu1 }
 0x251   : > { %v935_v32 = vadd.f32 %v1785_v24, %v934_v31 }
 0x252   : > { %v1871_v33 = vpop.f32.mrf.mxu1 }
 0x253   : > { %v940_v34 = vsel %vm781_vm3, %v935_v32, -inf }
 0x254   : > { %941 = vmax.xlane.f32.xlu0 %v940_v34  ;;  %v937_v35 = vpop.f32.mrf.mxu1 }
 0x256   : > { %v1872_v36 = vpop.f32.mrf.mxu1 }
 0x258   : > { %v1050_v37 = vpop.f32.mrf.mxu1 }
 0x259   : > { %v1051_v38 = vadd.f32 %v1785_v24, %v1050_v37 }
 0x25a   : > { %v1883_v39 = vpop.f32.mrf.mxu1 }
 0x25b   : > { %v1056_v40 = vsel %vm781_vm3, %v1051_v38, -inf  ;;  %v2028_v39 = vld [vmem:[%s2343_s11 + $0x8] sm:$0xff]  }
 0x25c   : > { %1057 = vmax.xlane.f32.xlu0 %v1056_v40  ;;  %v1053_v41 = vpop.f32.mrf.mxu1  ;;  %1904 = vmatpush3.bf16.msra.mxu1 %v2028_v39 }
 0x25d   : > { %v2029_v41 = vld [vmem:[%s2343_s11] sm:$0xff]   ;;  %1905 = vmatprep.subr.bf16.mxu1 %v2150_v2 }
 0x25e   : > { %v1884_v42 = vpop.f32.mrf.mxu1 }
 0x260   : > { %v1166_v43 = vpop.f32.mrf.mxu1  ;;  %1906 = vmatpush3.bf16.msra.mxu1 %v2029_v41 }
 0x261   : > { %v1167_v44 = vadd.f32 %v1785_v24, %v1166_v43  ;;  %1919 = vmatprep.subr.bf16.mxu1 %v2150_v2 }
 0x262   : > { %v1895_v45 = vpop.f32.mrf.mxu1 }
 0x263   : > { %v1172_v46 = vsel %vm781_vm3, %v1167_v44, -inf }
 0x264   : > { %1173 = vmax.xlane.f32.xlu1 %v1172_v46  ;;  %v1169_v47 = vpop.f32.mrf.mxu1 }
 0x266   : > { %v1896_v48 = vpop.f32.mrf.mxu1 }
 0x2d5   : > { %v830_v49 = vpop.xlane.xlu1 %829 }
 0x2d6   : > { %v831_v50 = vsub.f32 %v823_v26, %v830_v49 }
 0x2d8   : > { %v832_v51 = vmul.f32 1.442695, %v831_v50 }
 0x2da   : > { %2036 = vpow2.f32 %v832_v51 }
 0x2dd   : > { %v942_v52 = vpop.xlane.xlu0 %941 }
 0x2de   : > { %v943_v53 = vsub.f32 %v935_v32, %v942_v52 }
 0x2e0   : > { %v944_v54 = vmul.f32 1.442695, %v943_v53 }
 0x2e2   : > { %2038 = vpow2.f32 %v944_v54  ;;  %v1794_v54 = vld [vmem:[%s2655_s24] ss:$0 sm:$0xff] }
 0x2e5   : > { %v1058_v55 = vpop.xlane.xlu0 %1057 }
 0x2e6   : > { %v1059_v56 = vsub.f32 %v1051_v38, %v1058_v55 }
 0x2e7   : > { %v2037_v57 = vpop.eup %2036 }
 0x2e8   : > { %v1060_v58 = vmul.f32 1.442695, %v1059_v56  ;;  %v834_v59 = vsel %vm781_vm3, %v2037_v57, 0.0 }
 0x2e9   : > { %835 = vadd.xlane.f32.xlu0 %v834_v59 }
 0x2ea   : > { %2040 = vpow2.f32 %v1060_v58 }
 0x2ed   : > { %v1174_v0 = vpop.xlane.xlu1 %1173 }
 0x2ee   : > { %v1175_v1 = vsub.f32 %v1167_v44, %v1174_v0 }
 0x2ef   : > { %v2039_v60 = vpop.eup %2038 }
 0x2f0   : > { %v946_v61 = vsel %vm781_vm3, %v2039_v60, 0.0  ;;  %v1176_v3 = vmul.f32 1.442695, %v1175_v1 }
 0x2f1   : > { %947 = vadd.xlane.f32.xlu1 %v946_v61 }
 0x2f2   : > { %2042 = vpow2.f32 %v1176_v3 }
 0x2f7   : > { %v2041_v62 = vpop.eup %2040 }
 0x2f8   : > { %v1062_v63 = vsel %vm781_vm3, %v2041_v62, 0.0 }
 0x2f9   : > { %1063 = vadd.xlane.f32.xlu0 %v1062_v63 }
 0x2ff   : > { %v2043_v5 = vpop.eup %2042 }
 0x300   : > { %v1178_v6 = vsel %vm781_vm3, %v2043_v5, 0.0 }
 0x302   : > { %952 = vrot.lane.b32.xlu1 %v2409_v10, %s2159_s18 }
 0x30f   : > { %840 = vrot.lane.b32.xlu0 %v2409_v10, %s2160_s13 }
 0x313   : > { %1184 = vrot.lane.b32.xlu0 %v2409_v10, %s2161_s0 }
 0x326   : > { %1179 = vadd.xlane.f32.xlu1 %v1178_v6 }
 0x337   : > { %1068 = vrot.lane.b32.xlu1 %v2409_v10, %s2162_s9  ;;  %s2658_s9 = sld [smem:[#allocation25_spill]] }
 0x372   : > { %v836_v7 = vpop.xlane.xlu0 %835 }
 0x373   : > { %2044 = vrcp.f32 %v836_v7 }
 0x37a   : > { %v948_v8 = vpop.xlane.xlu1 %947 }
 0x37b   : > { %2046 = vrcp.f32 %v948_v8 }
 0x37e   : > { %v953_v15 = vpop.permute.xlu1 %952 }
 0x37f   : > { %v958_v18 = vsel %vm845_vm4, %v953_v15, 0  ;;  %v2033_v15 = vld [vmem:[%s2366_s4 + $0x10] sm:$0xff]  }
 0x380   : > { %v2045_v9 = vpop.eup %2044 }
 0x381   : > { %v838_v12 = vmul.f32 %v2045_v9, %v2037_v57 }
 0x382   : > { %v1064_v11 = vpop.xlane.xlu0 %1063 }
 0x383   : > { %v839_v16 = vpack.c.bf16 %v838_v12, %v838_v12  ;;  %2048 = vrcp.f32 %v1064_v11  ;;  %v2030_v12 = vld [vmem:[%s2352_s22 + $0x8] sm:$0xff]  }
 0x386   : > { %v841_v13 = vpop.permute.xlu0 %840 }
 0x387   : > { %v847_v14 = vsel %vm845_vm4, %v841_v13, 0  ;;  %v2031_v13 = vld [vmem:[%s2352_s22] sm:$0xff]  }
 0x388   : > { %1862 = vmatpush3.bf16.msra.mxu0 %v847_v14  ;;  %v2047_v17 = vpop.eup %2046  ;;  %v2032_v14 = vld [vmem:[%s2366_s4 + $0x18] sm:$0xff]  }
 0x389   : > { %1873 = vmatprep.subr.bf16.mxu0 %v2150_v2  ;;  %v950_v10 = vmul.f32 %v2047_v17, %v2039_v60 }
 0x38a   : > { %v1185_v25 = vpop.permute.xlu0 %1184 }
 0x38b   : > { %1864 = vmatmul.mubr.msk.bf16.vlgmr.msra.gmra.mxu0 %vm781_vm3, %v839_v16  ;;  %v951_v19 = vpack.c.bf16 %v950_v10, %v950_v10  ;;  %v1190_v27 = vsel %vm845_vm4, %v1185_v25, 0  ;;  %v1336_v25 = vld [vmem:[%s680_s21] sm:$0xf] }
 0x38c   : > { %1874 = vmatpush3.bf16.msra.mxu0 %v958_v18  ;;  %1875 = vmatprep.mubr.msk.bf16.mxu0 %vm2151_vm1, %v2150_v2 }
 0x38d   : > { %1885 = vmatprep.subr.bf16.mxu0 %v2150_v2 }
 0x390   : > { %v2049_v20 = vpop.eup %2048 }
 0x391   : > { %v1066_v22 = vmul.f32 %v2049_v20, %v2041_v62 }
 0x393   : > { %1876 = vmatmul.mubr.msk.bf16.vlgmr.msra.gmra.mxu0 %vm781_vm3, %v951_v19  ;;  %v1067_v26 = vpack.c.bf16 %v1066_v22, %v1066_v22 }
 0x394   : > { %1887 = vmatprep.mubr.msk.bf16.mxu0 %vm2151_vm1, %v2150_v2 }
 0x3af   : > { %v1180_v21 = vpop.xlane.xlu1 %1179 }
 0x3b0   : > { %2050 = vrcp.f32 %v1180_v21 }
 0x3b3   : > { %v1069_v23 = vpop.permute.xlu1 %1068 }
 0x3b4   : > { %v1074_v24 = vsel %vm845_vm4, %v1069_v23, 0 }
 0x3b5   : > { %1886 = vmatpush3.bf16.msra.mxu0 %v1074_v24 }
 0x3b6   : > { %1897 = vmatprep.subr.bf16.mxu0 %v2150_v2 }
 0x3b8   : > { %1888 = vmatmul.mubr.msk.bf16.vlgmr.msra.gmra.mxu0 %vm781_vm3, %v1067_v26  ;;  %v1339_v26 = vld [vmem:[%s684_s16] sm:$0xf]  ;;  %s2657_s16 = scalar_lea.vmem %s2595_s7, %s2322_s27 }
 0x3b9   : > { %1898 = vmatpush3.bf16.msra.mxu0 %v1190_v27  ;;  %1899 = vmatprep.mubr.msk.bf16.mxu0 %vm2151_vm1, %v2150_v2  ;;  %v1337_v27 = vunpack.c.l.bf16 %v1336_v25 }
 0x3ba   : > { %1911 = vmatprep.subr.bf16.mxu0 %v2150_v2 }
 0x3bd   : > { %v2051_v28 = vpop.eup %2050 }
 0x3be   : > { %v1182_v29 = vmul.f32 %v2051_v28, %v2043_v5 }
 0x3c0   : > { %v1183_v30 = vpack.c.bf16 %v1182_v29, %v1182_v29 }
 0x3c2   : > { %1900 = vmatmul.mubr.msk.bf16.vlgmr.msra.gmra.mxu0 %vm781_vm3, %v1183_v30  ;;  %v1340_v30 = vunpack.c.l.bf16 %v1339_v26 }
 0x3c3   : > { %1915 = vmatprep.mubr.msk.bf16.mxu0 %vm2151_vm1, %v2150_v2  ;;  %1912 = vmatpush3.bf16.msra.mxu0 %v2030_v12  ;;  %v1527_v12 = vld [vmem:[%s692_s6] sm:$0xf] }
 0x3c4   : > { %1913 = vmatprep.subr.bf16.mxu0 %v2150_v2 }
 0x3c7   : > { %1914 = vmatpush3.bf16.msra.mxu0 %v2031_v13 }
 0x44b   : > { %v883_v31 = vpop.f32.mrf.mxu0 }
 0x44c   : > { %889 = vst.msk [vmem:[#allocation3] sm:$0xff] %vm781_vm3, %v883_v31 }
 0x44d   : > { %v1865_v32 = vpop.f32.mrf.mxu0 }
 0x44f   : > { %v886_v33 = vpop.f32.mrf.mxu0 }
 0x451   : > { %v1866_v34 = vpop.f32.mrf.mxu0 }
 0x452   : > { %v2034_v34 = vld [vmem:[%s2366_s4 + $0x8] sm:$0xff]  }
 0x453   : > { %v994_v35 = vpop.f32.mrf.mxu0 }
 0x454   : > { %1001 = vrot.lane.b32.xlu1 %v994_v35, %s2163_s25  ;;  %v2035_v35 = vld [vmem:[%s2366_s4] sm:$0xff]   ;;  %s2659_s25 = scalar_lea.vmem %s2658_s9, %s2322_s27 }
 0x455   : > { %v1877_v36 = vpop.f32.mrf.mxu0 }
 0x456   : > { %v1798_v36 = vld [vmem:[%s2657_s16] ss:$0 sm:$0xff] }
 0x457   : > { %v997_v37 = vpop.f32.mrf.mxu0 }
 0x459   : > { %v1878_v38 = vpop.f32.mrf.mxu0 }
 0x478   : > { %v1110_v40 = vpop.f32.mrf.mxu0 }
 0x479   : > { %1117 = vrot.lane.b32.xlu0 %v1110_v40, %s2164_s26 }
 0x47a   : > { %v1889_v42 = vpop.f32.mrf.mxu0 }
 0x47c   : > { %v1113_v43 = vpop.f32.mrf.mxu0 }
 0x47e   : > { %v1890_v44 = vpop.f32.mrf.mxu0 }
 0x482   : > { %v1226_v45 = vpop.f32.mrf.mxu0 }
 0x483   : > { %1233 = vrot.lane.b32.xlu1 %v1226_v45, %s2165_s15 }
 0x484   : > { %v1901_v46 = vpop.f32.mrf.mxu0 }
 0x486   : > { %v1229_v47 = vpop.f32.mrf.mxu0 }
 0x488   : > { %v1902_v48 = vpop.f32.mrf.mxu0 }
 0x4c6   : > { %v1002_v49 = vpop.permute.xlu1 %1001 }
 0x4c7   : > { %1005 = vst.msk [vmem:[#allocation3] sm:$0xff] %vm1004_vm5, %v1002_v49 }
 0x4eb   : > { %v1118_v50 = vpop.permute.xlu0 %1117 }
 0x4ec   : > { %1121 = vst.msk [vmem:[#allocation3] sm:$0xff] %vm1120_vm6, %v1118_v50 }
 0x4f5   : > { %v1234_v51 = vpop.permute.xlu1 %1233 }
 0x4f6   : > { %1237 = vst.msk [vmem:[#allocation3] sm:$0xff] %vm1236_vm7, %v1234_v51 }
 0x4fd   : > { %v1238_v52 = vld [vmem:[#allocation3] sm:$0xff] }
 0x4fe   : > { %v1239_v53 = vpack.c.bf16 %v1238_v52, %v1238_v52 }
 0x500   : > { %1908 = vmatmul.mubr.msk.bf16.vlgmr.msra.gmra.mxu1 %vm727_vm2, %v1239_v53 }
 0x501   : > { %1927 = vmatprep.mubr.msk.bf16.mxu1 %vm2151_vm1, %v2150_v2  ;;  %1920 = vmatpush3.bf16.msra.mxu1 %v2032_v14 }
 0x502   : > { %1921 = vmatprep.subr.bf16.mxu1 %v2150_v2 }
 0x505   : > { %1922 = vmatpush3.bf16.msra.mxu1 %v2033_v15 }
 0x506   : > { %1923 = vmatprep.subr.bf16.mxu1 %v2150_v2 }
 0x509   : > { %1924 = vmatpush3.bf16.msra.mxu1 %v2034_v34 }
 0x50a   : > { %1925 = vmatprep.subr.bf16.mxu1 %v2150_v2  ;;  %v1802_v2 = vld [vmem:[%s2659_s25] ss:$0 sm:$0xff] }
 0x50d   : > { %1926 = vmatpush3.bf16.msra.mxu1 %v2035_v35 }
 0x5c0   : > { %v1300_v55 = vpop.f32.mrf.mxu1 }
 0x5c1   : > { %v1301_v56 = vadd.f32 %v1794_v54, %v1300_v55 }
 0x5c2   : > { %v1909_v57 = vpop.f32.mrf.mxu1 }
 0x5c3   : > { %v1306_v58 = vadd.f32 %v1301_v56, %v2393_v4 }
 0x5c4   : > { %v1303_v59 = vpop.f32.mrf.mxu1 }
 0x5c5   : > { %v1307_v60 = vsel %vm727_vm2, %v1306_v58, 0.0 }
 0x5c6   : > { %1308 = vadd.xlane.f32.xlu0 %v1307_v60  ;;  %v1910_v61 = vpop.f32.mrf.mxu1 }
 0x64f   : > { %v1309_v62 = vpop.xlane.xlu0 %1308 }
 0x650   : > { %v1310_v63 = vrot.slane %v1309_v62, 4 }
 0x652   : > { %v1311_v0 = vadd.f32 %v1310_v63, %v1309_v62 }
 0x654   : > { %v1312_v1 = vrot.slane %v1311_v0, 2 }
 0x656   : > { %v1313_v3 = vadd.f32 %v1312_v1, %v1311_v0 }
 0x658   : > { %v1314_v5 = vrot.slane %v1313_v3, 1 }
 0x65a   : > { %v1315_v6 = vadd.f32 %v1314_v5, %v1313_v3 }
 0x65c   : > { %1931 = vpush %v1315_v6 }
 0x68d   : > { %s1932_s29 = spop %1931 }
 0x68e   : > { %v1317_v7 = vstv %s1932_s29 }
 0x68f   : > { %v1318_v4 = vmul.f32 0.00390625, %v1317_v7 }
 0x691   : > { %v1319_v8 = vsub.f32 %v1306_v58, %v1318_v4 }
 0x693   : > { %v1320_v9 = vmul.f32 %v1319_v8, %v1319_v8 }
 0x695   : > { %v1321_v11 = vsel %vm727_vm2, %v1320_v9, 0.0 }
 0x696   : > { %1322 = vadd.xlane.f32.xlu1 %v1321_v11  ;;  %v1524_v11 = vld [vmem:[%s688_s2] sm:$0xf] }
 0x697   : > { %v1525_v13 = vunpack.c.l.bf16 %v1524_v11 }
 0x71f   : > { %v1323_v16 = vpop.xlane.xlu1 %1322 }
 0x720   : > { %v1324_v17 = vrot.slane %v1323_v16, 4 }
 0x722   : > { %v1325_v18 = vadd.f32 %v1324_v17, %v1323_v16  ;;  %v1528_v16 = vunpack.c.l.bf16 %v1527_v12 }
 0x724   : > { %v1326_v10 = vrot.slane %v1325_v18, 2 }
 0x726   : > { %v1327_v19 = vadd.f32 %v1326_v10, %v1325_v18 }
 0x728   : > { %v1328_v20 = vrot.slane %v1327_v19, 1 }
 0x72a   : > { %v1329_v21 = vadd.f32 %v1328_v20, %v1327_v19 }
 0x72c   : > { %1933 = vpush %v1329_v21 }
 0x75d   : > { %s1934_s22 = spop %1933 }
 0x75e   : > { %v1331_v22 = vstv %s1934_s22  ;;  %s2662_s22 = sld [smem:[#allocation10_spill]] }
 0x75f   : > { %v1332_v23 = vmul.f32 0.00390625, %v1331_v22 }
 0x761   : > { %v1333_v24 = vadd.f32 1e-06, %v1332_v23 }
 0x763   : > { %2052 = vrsqrt.f32 %v1333_v24 }
 0x764   : > { %p1808_p1 = scmp.ne.s32.totalorder %s2662_s22, 1 }
 0x770   : > { %v2053_v28 = vpop.eup %2052 }
 0x771   : > { %v1335_v29 = vmul.f32 %v2053_v28, %v1319_v8 }
 0x773   : > { %v1338_v31 = vmul.f32 %v1337_v27, %v1335_v29 }
 0x775   : > { %v1341_v32 = vadd.f32 %v1340_v30, %v1338_v31 }
 0x777   : > { %v1342_v33 = vpack.c.bf16 %v1341_v32, %v1341_v32 }
 0x779   : > { %1916 = vmatmul.mubr.msk.bf16.vlgmr.msra.gmra.mxu0 %vm727_vm2, %v1342_v33 }
 0x839   : > { %v1403_v37 = vpop.f32.mrf.mxu0 }
 0x83a   : > { %v1404_v38 = vadd.f32 %v1798_v36, %v1403_v37 }
 0x83b   : > { %v1917_v39 = vpop.f32.mrf.mxu0 }
 0x83c   : > { %v1409_v40 = vmax.f32 %v1404_v38, 0.0 }
 0x83d   : > { %v1406_v41 = vpop.f32.mrf.mxu0 }
 0x83e   : > { %v1410_v42 = vpack.c.bf16 %v1409_v40, %v1409_v40 }
 0x83f   : > { %v1918_v43 = vpop.f32.mrf.mxu0 }
 0x840   : > { %1928 = vmatmul.mubr.msk.bf16.vlgmr.msra.gmra.mxu1 %vm1450_vm8, %v1410_v42 }
 0x900   : > { %v1488_v44 = vpop.f32.mrf.mxu1 }
 0x901   : > { %v1489_v45 = vadd.f32 %v1802_v2, %v1488_v44 }
 0x902   : > { %v1929_v46 = vpop.f32.mrf.mxu1 }
 0x903   : > { %v1494_v47 = vadd.f32 %v1489_v45, %v1341_v32 }
 0x904   : > { %v1491_v48 = vpop.f32.mrf.mxu1 }
 0x905   : > { %v1495_v49 = vsel %vm727_vm2, %v1494_v47, 0.0 }
 0x906   : > { %1496 = vadd.xlane.f32.xlu0 %v1495_v49  ;;  %v1930_v50 = vpop.f32.mrf.mxu1 }
 0x98f   : > { %v1497_v51 = vpop.xlane.xlu0 %1496 }
 0x990   : > { %v1498_v52 = vrot.slane %v1497_v51, 4 }
 0x992   : > { %v1499_v53 = vadd.f32 %v1498_v52, %v1497_v51 }
 0x994   : > { %v1500_v54 = vrot.slane %v1499_v53, 2 }
 0x996   : > { %v1501_v55 = vadd.f32 %v1500_v54, %v1499_v53 }
 0x998   : > { %v1502_v56 = vrot.slane %v1501_v55, 1 }
 0x99a   : > { %v1503_v57 = vadd.f32 %v1502_v56, %v1501_v55 }
 0x99c   : > { %1935 = vpush %v1503_v57 }
 0x9cd   : > { %s1936_s4 = spop %1935 }
 0x9ce   : > { %v1505_v58 = vstv %s1936_s4 }
 0x9cf   : > { %v1506_v59 = vmul.f32 0.00390625, %v1505_v58 }
 0x9d1   : > { %v1507_v60 = vsub.f32 %v1494_v47, %v1506_v59 }
 0x9d3   : > { %v1508_v61 = vmul.f32 %v1507_v60, %v1507_v60 }
 0x9d5   : > { %v1509_v62 = vsel %vm727_vm2, %v1508_v61, 0.0 }
 0x9d6   : > { %1510 = vadd.xlane.f32.xlu0 %v1509_v62 }
 0xa5f   : > { %v1511_v63 = vpop.xlane.xlu0 %1510 }
 0xa60   : > { %v1512_v0 = vrot.slane %v1511_v63, 4 }
 0xa62   : > { %v1513_v1 = vadd.f32 %v1512_v0, %v1511_v63 }
 0xa64   : > { %v1514_v3 = vrot.slane %v1513_v1, 2 }
 0xa66   : > { %v1515_v5 = vadd.f32 %v1514_v3, %v1513_v1 }
 0xa68   : > { %v1516_v6 = vrot.slane %v1515_v5, 1 }
 0xa6a   : > { %v1517_v7 = vadd.f32 %v1516_v6, %v1515_v5 }
 0xa6c   : > { %1937 = vpush %v1517_v7 }
 0xa9d   : > { %s1938_s27 = spop %1937 }
 0xa9e   : > { %v1519_v4 = vstv %s1938_s27 }
 0xa9f   : > { %v1520_v8 = vmul.f32 0.00390625, %v1519_v4 }
 0xaa1   : > { %v1521_v9 = vadd.f32 1e-06, %v1520_v8 }
 0xaa3   : > { %2054 = vrsqrt.f32 %v1521_v9 }
 0xab0   : > { %v2055_v14 = vpop.eup %2054 }
 0xab1   : > { %v1523_v15 = vmul.f32 %v2055_v14, %v1507_v60 }
 0xab3   : > { %v1526_v17 = vmul.f32 %v1525_v13, %v1523_v15  ;;  %1534 = sbr.rel (%p1808_p1) target bundleno = 2745 (0xab9), region = 84 }
 0xab5   : > { %v1529_v18 = vadd.f32 %v1528_v16, %v1526_v17 }
 0xab7   : > { %1530 = vst.msk [vmem:[#allocation2] sm:$0xff] %vm727_vm2, %v1529_v18 }
 0xab8   : > { %1535 = vst.msk [vmem:[%s637_s8] sm:$0xff] %vm727_vm2, %v1529_v18 }
 0xab9 PF: > { %s2663_s2 = sld [smem:[#allocation11_spill]]  ;;  %s1550_s18 = sshll.u32 %s637_s8, 4  ;;  %s1551_s18 = int_to_ptr.vmem [resolvable:$true] %s1550_s18 }
 0xaba   : > { %s2664_s19 = sld [smem:[#allocation8_spill]]  ;;  %s2056_s0 = scalar_lea.vmem %s1551_s18, 128 }
 0xabb   : > { %s2666_s17 = sld [smem:[#allocation29_spill]]  ;;  %p2057_p2 = scmp.ne.s32.totalorder %s1551_s18, %s2056_s0 }
 0xabc   : > { %s2166_s9 = smov [#allocation4]  }
 0xabd   : > { %p2058_p4 = pnand %p2057_p2, %p2291_p3  ;;  %s2060_s25 = sshll.u32 %s2166_s9, 4  ;;  %s2061_s25 = int_to_ptr.vmem [resolvable:$false] %s2060_s25 }
 0xabe   : > { %s2062_s4 = scalar_lea.vmem %s2061_s25, 256  ;;  %p2063_p6 = scmp.lt.s32.totalorder %s1551_s18, %s2061_s25 }
 0xabf   : > { %s1810_s28 = sshll.u32 %s2663_s2, 7  ;;  %p2059_p5 = pneg %p2058_p4 }
 0xac0   : > { %s2668_s16 = sand.u32 1, %s2664_s19   ;;  %p2064_p7 = scmp.lt.s32.totalorder %s2062_s4, %s2056_s0 }
 0xac1   : > { %s2667_s21 = smov %s2666_s17  ;;  %s1548_s30 = scalar_lea.hbm %s2666_s17, %s1810_s28 }
 0xac2   : > { %s1537_s13 = scalar_lea.sflag [#allocation5], %s2668_s16  ;;  %p2065_p8 = por %p2064_p7, %p2063_p6 }
 0xac4   : > { %p2066_p10 = pnand %p2065_p8, %p2059_p5 }
 0xac6   : > { %2069 = shalt.err (!%p2066_p10)
}
 0xac7   : > { %s2070_s27 = scalar_lea.hbm %s1548_s30, 128  ;;  %s2074_s26 = scalar_lea.hbm %s2667_s21, 256 }
 0xac8   : > { %p2071_p11 = scmp.ne.s32.totalorder %s1548_s30, %s2070_s27  ;;  %p2075_p0 = scmp.lt.s32.totalorder %s1548_s30, %s2667_s21 }
 0xac9   : > { %p2076_p1 = scmp.lt.s32.totalorder %s2074_s26, %s2070_s27 }
 0xaca   : > { %p2072_p12 = pnand %p2071_p11, %p2291_p3 }
 0xacb   : > { %p2077_p2 = por %p2076_p1, %p2075_p0 }
 0xacc   : > { %p2073_p13 = pneg %p2072_p12 }
 0xace   : > { %p2078_p4 = pnand %p2077_p2, %p2073_p13 }
 0xad0   : > { %2081 = shalt.err (!%p2078_p4)
}
 0xad1   : > { %1939 = dma.vmem_to_hbm [thread:$0]  (%p2291_p3), %s1551_s18, 128, %s1548_s30, %s1537_s13  }
 0xad2 PF: > { %s2669_s12 = sld [smem:[#allocation14_spill]] }
 0xad3   : > { %s2670_s24 = sld [smem:[#allocation7_spill]] }
 0xad8   : > { %p1945_p5 = scmp.ge.s32.totalorder %s2669_s12, 2 }
 0xad9   : > { %s1562_s22 = sand.u32 1, %s2670_s24  }
 0xada   : > { %p1942_p6 = pnand %p1945_p5, %p2301_p9  ;;  %s1563_s2 = scalar_lea.sflag [#allocation5], %s1562_s22 }
 0xadc   : > { %p1943_p7 = pneg %p1942_p6 }
 0xade   : > { %2115 = dma.done.wait (%p1943_p7), %s1563_s2, 128  }
 0xadf   : > { %2117 = vsyncadd (%p1943_p7), %s1563_s2, 4294967168  ;;  %s27_s20 = sadd.s32 1, %s2669_s12   ;;  %s2672_s29 = sld [smem:[#allocation8_spill]] }
 0xae0   : > { %p24_p8 = scmp.ge.s32.totalorder %s27_s20, 6   ;;  %s2673_s30 = sld [smem:[#allocation9_spill]] }
 0xae1   : > { %s2674_s15 = sld [smem:[#allocation19_spill]] }
 0xae2   : > { %s2675_s16 = sld [smem:[#allocation12_spill]]  ;;  %26 = sbr.rel (!%p24_p8) target bundleno = 16 (0x10), region = 158 }
 0xae3   : > { %s2676_s17 = sld [smem:[#allocation13_spill]] }
 0xae4   : > { %s2677_s18 = sld [smem:[#allocation15_spill]] }
 0xae5   : > { %s2678_s19 = sld [smem:[#allocation17_spill]] }
 0xae7   :  { %1568 = vsyncpa [#allocation5], 1 }
 0xae8   :  { %1570 = vsyncpa [#allocation5 + $0x1], 1 }

</bundles_post_ra>
